<compile_context>
chip_gen: v7x
topology: tpu7x:2x2x1
jax: 0.10.0
libtpu: 0.0.40
codegen_flags: <defaults>
</compile_context>

<pallas_src>
import functools

import jax
import jax.numpy as jnp
from jax import lax
from jax.experimental import pallas as pl
from jax.experimental.pallas import tpu as pltpu


def _attn_kernel(x_ref, w_ref, b_ref, mask_ref, o_ref, *, kqv_dim):
    # x_ref: (N, H)  w_ref: (H, 3D)  b_ref: (1, 3D)  mask_ref: (N, N)
    # o_ref: (N, D)  with N = B*S.  Scale is pre-folded into the Q columns.
    x = x_ref[...]                                                   # (N, H)

    # Fused K/Q/V projection: one MXU push.
    kqv = jnp.dot(x, w_ref[...],
                  preferred_element_type=jnp.float32) + b_ref[...]   # (N, 3D)

    D = kqv_dim
    k = kqv[:, 0 * D:1 * D]                                          # (N, D)
    q = kqv[:, 1 * D:2 * D]                                          # (N, D), pre-scaled
    v = kqv[:, 2 * D:3 * D]                                          # (N, D)

    # Block-diagonal scores: contract on D (no transpose through the XLU),
    # then add the precomputed -1e30 cross-batch mask.
    s = lax.dot_general(
        q, k,
        dimension_numbers=(((1,), (1,)), ((), ())),
        preferred_element_type=jnp.float32) + mask_ref[...]          # (N, N)

    # Numerically-stable softmax; reciprocal goes to the EUP (approx) slot.
    s = s - jnp.max(s, axis=-1, keepdims=True)
    p = jnp.exp(s)
    w = p * pl.reciprocal(jnp.sum(p, axis=-1, keepdims=True), approx=True)

    # Single output matmul + one direct store (no concat, no partial stores).
    o_ref[...] = jnp.dot(w, v,
                         preferred_element_type=jnp.float32).astype(o_ref.dtype)


def make_attn_params(wk, bk, wq, bq, wv, bv, batch, seq):
    """One-time parameter setup (hoisted out of the per-call path).

    Fuses the three nn.Linear projections into a single (H, 3D) weight and
    (1, 3D) bias, folds 1/sqrt(D) into the Q slice, and precomputes the
    additive block-diagonal cross-batch mask.
    """
    D = wk.shape[0]
    scale = jnp.float32(1.0 / (D ** 0.5))

    w_fused = jnp.concatenate([wk.T, (wq * scale).T, wv.T], axis=1)   # (H, 3D)
    b_fused = jnp.concatenate([bk, bq * scale, bv]).reshape(1, 3 * D)  # (1, 3D)

    n = batch * seq
    row_batch = jnp.arange(n, dtype=jnp.int32) // seq
    mask = jnp.where(row_batch[:, None] == row_batch[None, :],
                     jnp.float32(0.0), jnp.float32(-1e30))            # (N, N)
    return w_fused, b_fused, mask


def attn_forward(x, params):
    """x: (B, S, H); params from make_attn_params (computed once)."""
    B, S, H = x.shape
    w_fused, b_fused, mask = params
    D = w_fused.shape[1] // 3
    N = B * S

    x2d = x.reshape(N, H)
    kernel = functools.partial(_attn_kernel, kqv_dim=D)

    out2d = pl.pallas_call(
        kernel,
        out_shape=jax.ShapeDtypeStruct((N, D), jnp.float32),
        grid_spec=pltpu.PrefetchScalarGridSpec(
            num_scalar_prefetch=0,
            grid=(1,),                                     # single grid step
            in_specs=[
                pl.BlockSpec((N, H), lambda i: (0, 0)),        # x (flattened)
                pl.BlockSpec((H, 3 * D), lambda i: (0, 0)),    # fused weight
                pl.BlockSpec((1, 3 * D), lambda i: (0, 0)),    # fused bias
                pl.BlockSpec((N, N), lambda i: (0, 0)),        # block-diag mask
            ],
            out_specs=pl.BlockSpec((N, D), lambda i: (0, 0)),
        ),
        compiler_params=pltpu.CompilerParams(
            dimension_semantics=("arbitrary",)),
    )(x2d, w_fused, b_fused, mask)

    return out2d.reshape(B, S, D)


def attn_reference(x, wk, bk, wq, bq, wv, bv):
    """Pure-JAX reference mirroring the PyTorch forward."""
    k = jnp.einsum("bsh,dh->bsd", x, wk) + bk
    q = jnp.einsum("bsh,dh->bsd", x, wq) + bq
    v = jnp.einsum("bsh,dh->bsd", x, wv) + bv
    d = wk.shape[0] ** 0.5
    w = jax.nn.softmax(jnp.einsum("bqd,bkd->bqk", q, k) / d, axis=-1)
    return jnp.einsum("bqk,bkd->bqd", w, v)


if __name__ == "__main__":
    hidden_dim, kqv_dim = 32, 16
    B, S = 2, 8

    key = jax.random.PRNGKey(0)
    kx, kwk, kbk, kwq, kbq, kwv, kbv = jax.random.split(key, 7)

    x = jax.random.normal(kx, (B, S, hidden_dim), dtype=jnp.float32)

    # nn.Linear-shaped params: weight (out, in), bias (out,)
    bound = 1.0 / (hidden_dim ** 0.5)
    wk = jax.random.uniform(kwk, (kqv_dim, hidden_dim), minval=-bound, maxval=bound)
    bk = jax.random.uniform(kbk, (kqv_dim,), minval=-bound, maxval=bound)
    wq = jax.random.uniform(kwq, (kqv_dim, hidden_dim), minval=-bound, maxval=bound)
    bq = jax.random.uniform(kbq, (kqv_dim,), minval=-bound, maxval=bound)
    wv = jax.random.uniform(kwv, (kqv_dim, hidden_dim), minval=-bound, maxval=bound)
    bv = jax.random.uniform(kbv, (kqv_dim,), minval=-bound, maxval=bound)

    # One-time parameter fusion (outside the per-call path).
    params = make_attn_params(wk, bk, wq, bq, wv, bv, batch=B, seq=S)
    params = jax.block_until_ready(params)

    out = attn_forward(x, params)
    out = jax.block_until_ready(out)

    ref = attn_reference(x, wk, bk, wq, bq, wv, bv)
    assert out.shape == (B, S, kqv_dim)
    # tolerance loosened slightly for the EUP approx-reciprocal softmax denom
    assert jnp.allclose(out, ref, atol=1e-3, rtol=1e-3), "mismatch vs reference"

    print("KERNEL_OK")
</pallas_src>

<mosaic_0001>
module attributes {stable_mosaic.version = 11 : i64} {
  func.func @_attn_kernel(%arg0: i32, %arg1: memref<16x32xf32, #tpu.memory_space<vmem>>, %arg2: memref<32x48xf32, #tpu.memory_space<vmem>>, %arg3: memref<1x48xf32, #tpu.memory_space<vmem>>, %arg4: memref<16x16xf32, #tpu.memory_space<vmem>>, %arg5: memref<16x16xf32, #tpu.memory_space<vmem>>) attributes {dimension_semantics = [#tpu.dimension_semantics<arbitrary>], iteration_bounds = array<i64: 1>, scalar_prefetch = 0 : i64, scratch_operands = 0 : i64, tpu.core_type = #tpu.core_type<tc>, window_params = [{pipeline_mode = #tpu.pipeline_mode<synchronous>, transform_indices = @transform_0, window_bounds = array<i64: 16, 32>}, {pipeline_mode = #tpu.pipeline_mode<synchronous>, transform_indices = @transform_1, window_bounds = array<i64: 32, 48>}, {pipeline_mode = #tpu.pipeline_mode<synchronous>, transform_indices = @transform_2, window_bounds = array<i64: 1, 48>}, {pipeline_mode = #tpu.pipeline_mode<synchronous>, transform_indices = @transform_3, window_bounds = array<i64: 16, 16>}, {pipeline_mode = #tpu.pipeline_mode<synchronous>, transform_indices = @transform_4, window_bounds = array<i64: 16, 16>}]} {
    %c0 = arith.constant 0 : index
    %c0_0 = arith.constant 0 : index
    %0 = vector.load %arg1[%c0, %c0_0] : memref<16x32xf32, #tpu.memory_space<vmem>>, vector<16x32xf32>
    %c0_1 = arith.constant 0 : index
    %c0_2 = arith.constant 0 : index
    %1 = vector.load %arg2[%c0_1, %c0_2] : memref<32x48xf32, #tpu.memory_space<vmem>>, vector<32x48xf32>
    %cst = arith.constant dense<0.000000e+00> : vector<16x48xf32>
    %2 = tpu.matmul %0, %1, %cst {dimension_numbers = #tpu.dot_dimension_numbers<[1], [0], [0], [1], [0, 0, 1, 1], [], []>} : vector<16x32xf32>, vector<32x48xf32>, vector<16x48xf32> -> vector<16x48xf32>
    %c0_3 = arith.constant 0 : index
    %c0_4 = arith.constant 0 : index
    %3 = vector.load %arg3[%c0_3, %c0_4] : memref<1x48xf32, #tpu.memory_space<vmem>>, vector<1x48xf32>
    %4 = vector.broadcast %3 : vector<1x48xf32> to vector<16x48xf32>
    %5 = arith.addf %2, %4 : vector<16x48xf32>
    %6 = vector.extract_strided_slice %5 {offsets = [0, 0], sizes = [16, 16], strides = [1, 1]} : vector<16x48xf32> to vector<16x16xf32>
    %7 = vector.extract_strided_slice %5 {offsets = [0, 16], sizes = [16, 16], strides = [1, 1]} : vector<16x48xf32> to vector<16x16xf32>
    %8 = vector.extract_strided_slice %5 {offsets = [0, 32], sizes = [16, 16], strides = [1, 1]} : vector<16x48xf32> to vector<16x16xf32>
    %cst_5 = arith.constant dense<0.000000e+00> : vector<16x16xf32>
    %9 = tpu.matmul %7, %6, %cst_5 {dimension_numbers = #tpu.dot_dimension_numbers<[1], [1], [0], [0], [0, 0, 1, 0], [], []>} : vector<16x16xf32>, vector<16x16xf32>, vector<16x16xf32> -> vector<16x16xf32>
    %c0_6 = arith.constant 0 : index
    %c0_7 = arith.constant 0 : index
    %10 = vector.load %arg4[%c0_6, %c0_7] : memref<16x16xf32, #tpu.memory_space<vmem>>, vector<16x16xf32>
    %11 = arith.addf %9, %10 : vector<16x16xf32>
    %cst_8 = arith.constant dense<0xFF800000> : vector<16xf32>
    %12 = vector.multi_reduction <maximumf>, %11, %cst_8 [1] : vector<16x16xf32> to vector<16xf32>
    %13 = vector.shape_cast %12 : vector<16xf32> to vector<16x1xf32>
    %14 = vector.broadcast %13 : vector<16x1xf32> to vector<16x16xf32>
    %15 = arith.subf %11, %14 : vector<16x16xf32>
    %16 = math.exp %15 : vector<16x16xf32>
    %cst_9 = arith.constant dense<0.000000e+00> : vector<16xf32>
    %17 = vector.multi_reduction <add>, %16, %cst_9 [1] : vector<16x16xf32> to vector<16xf32>
    %18 = vector.shape_cast %17 : vector<16xf32> to vector<16x1xf32>
    %19 = tpu.reciprocal %18 {approx = true} : vector<16x1xf32> -> vector<16x1xf32>
    %20 = vector.broadcast %19 : vector<16x1xf32> to vector<16x16xf32>
    %21 = arith.mulf %16, %20 : vector<16x16xf32>
    %cst_10 = arith.constant dense<0.000000e+00> : vector<16x16xf32>
    %22 = tpu.matmul %21, %8, %cst_10 {dimension_numbers = #tpu.dot_dimension_numbers<[1], [0], [0], [1], [0, 0, 1, 1], [], []>} : vector<16x16xf32>, vector<16x16xf32>, vector<16x16xf32> -> vector<16x16xf32>
    %c0_11 = arith.constant 0 : index
    %c0_12 = arith.constant 0 : index
    %23 = vector.load %arg5[%c0_11, %c0_12] : memref<16x16xf32, #tpu.memory_space<vmem>>, vector<16x16xf32>
    tpu.vector_store %arg5[%c0_11, %c0_12], %22 {strides = array<i32>} : memref<16x16xf32, #tpu.memory_space<vmem>>, vector<16x16xf32>,
    return
  }
  func.func @transform_0(%arg0: i32) -> (i32, i32) {
    %c0_i32 = arith.constant 0 : i32
    %c0_i32_0 = arith.constant 0 : i32
    %c0_i32_1 = arith.constant 0 : i32
    return %c0_i32, %c0_i32_0 : i32, i32
  }
  func.func @transform_1(%arg0: i32) -> (i32, i32) {
    %c0_i32 = arith.constant 0 : i32
    %c0_i32_0 = arith.constant 0 : i32
    %c0_i32_1 = arith.constant 0 : i32
    return %c0_i32, %c0_i32_0 : i32, i32
  }
  func.func @transform_2(%arg0: i32) -> (i32, i32) {
    %c0_i32 = arith.constant 0 : i32
    %c0_i32_0 = arith.constant 0 : i32
    %c0_i32_1 = arith.constant 0 : i32
    return %c0_i32, %c0_i32_0 : i32, i32
  }
  func.func @transform_3(%arg0: i32) -> (i32, i32) {
    %c0_i32 = arith.constant 0 : i32
    %c0_i32_0 = arith.constant 0 : i32
    %c0_i32_1 = arith.constant 0 : i32
    return %c0_i32, %c0_i32_0 : i32, i32
  }
  func.func @transform_4(%arg0: i32) -> (i32, i32) {
    %c0_i32 = arith.constant 0 : i32
    %c0_i32_0 = arith.constant 0 : i32
    %c0_i32_1 = arith.constant 0 : i32
    return %c0_i32, %c0_i32_0 : i32, i32
  }
}

</mosaic_0001>

<bundles_post_ra>
// kernel: tpu_custom_call.1
= control target key start
LH: loop header
LB: loop body
LE: loop exit
PB: predicated region body
PF: predicated region fallthrough
CT: control target
= control target key end

     0   :  { %9 = vsyncpa [#allocation3], 0  ;;  %s671_s0 = inlined_call_operand.hbm [shape: f32[16,32], index: 0, kind: input, shape index: {}]   ;;  %s672_s1 = inlined_call_operand.hbm [shape: f32[32,48], index: 1, kind: input, shape index: {}]   ;;  %s673_s2 = inlined_call_operand.vmem [shape: f32[1,48], index: 2, kind: input, shape index: {}]   ;;  %s674_s3 = inlined_call_operand.hbm [shape: f32[16,16], index: 3, kind: input, shape index: {}]   ;;  %s675_s4 = inlined_call_operand.hbm [shape: f32[16,16], index: 4, kind: output, shape index: {}]  }
   0x1   :  { %10 = vsyncpa [#allocation6], 0 }
   0x2   :  { %11 = vsyncpa [#allocation4], 0  ;;  %s556_s15 = smov [#allocation5]   ;;  %s557_s17 = smov [#allocation2]  }
   0x3   :  { %s29_s16 = sshll.u32 %s556_s15, 4  ;;  %s17_s18 = sshll.u32 %s557_s17, 4  ;;  %s30_s16 = int_to_ptr.vmem [resolvable:$true] %s29_s16  ;;  %s589_s18 = int_to_ptr.vmem [resolvable:$true] %s17_s18 }
   0x4   :  { %s462_s21 = scalar_lea.hbm %s672_s1, 512 }
   0x5   :  { %p463_p0 = scmp.ne.s32.totalorder %s672_s1, %s462_s21  ;;  %p466_p1 = scmp.lt.u32.totalorder %s462_s21, %s672_s1 }
   0x7   :  { %p468_p2 = pnand %p466_p1, %p463_p0 }
   0x9   :  { %471 = shalt.err (!%p468_p2)
}
   0xa   :  { %s472_s26 = scalar_lea.vmem %s30_s16, 512  ;;  %p477_p4 = scmp.lt.s32.totalorder %s30_s16, %s30_s16 }
   0xb   :  { %p473_p3 = scmp.ne.s32.totalorder %s30_s16, %s472_s26  ;;  %p478_p5 = scmp.lt.s32.totalorder %s472_s26, %s472_s26 }
   0xd   :  { %p479_p6 = por %p478_p5, %p477_p4 }
   0xf   :  { %p480_p7 = pnand %p479_p6, %p473_p3 }
  0x11   :  { %483 = shalt.err (!%p480_p7)
}
  0x12   :  { %s558_s27 = smov 128   ;;  %s559_s28 = smov 8  }
  0x13   :  { %35 = dma.hbm_to_vmem [thread:$0]  %s672_s1, 512, %s30_s16, [#allocation6], %s558_s27, %s558_s27, %s559_s28  }
  0x14   :  { %s484_s7 = scalar_lea.hbm %s671_s0, 256 }
  0x15   :  { %p485_p8 = scmp.ne.s32.totalorder %s671_s0, %s484_s7  ;;  %p488_p9 = scmp.lt.u32.totalorder %s484_s7, %s671_s0 }
  0x17   :  { %p490_p10 = pnand %p488_p9, %p485_p8 }
  0x19   :  { %493 = shalt.err (!%p490_p10)
}
  0x1a   :  { %s494_s12 = scalar_lea.vmem %s589_s18, 256  ;;  %p499_p12 = scmp.lt.s32.totalorder %s589_s18, %s589_s18 }
  0x1b   :  { %p495_p11 = scmp.ne.s32.totalorder %s589_s18, %s494_s12  ;;  %p500_p13 = scmp.lt.s32.totalorder %s494_s12, %s494_s12 }
  0x1d   :  { %p501_p0 = por %p500_p13, %p499_p12 }
  0x1f   :  { %p502_p1 = pnand %p501_p0, %p495_p11 }
  0x21   :  { %505 = shalt.err (!%p502_p1)
}
  0x22   :  { %23 = dma.hbm_to_vmem [thread:$0]  %s671_s0, 256, %s589_s18, [#allocation3], %s558_s27, %s558_s27, %s559_s28  }
  0x23   :  { %s560_s14 = smov [#allocation7]   ;;  %s506_s19 = scalar_lea.hbm %s674_s3, 256 }
  0x24   :  { %s43_s15 = sshll.u32 %s560_s14, 4  ;;  %p507_p2 = scmp.ne.s32.totalorder %s674_s3, %s506_s19  ;;  %s44_s15 = int_to_ptr.vmem [resolvable:$true] %s43_s15 }
  0x25   :  { %p510_p3 = scmp.lt.u32.totalorder %s506_s19, %s674_s3 }
  0x27   :  { %p512_p4 = pnand %p510_p3, %p507_p2 }
  0x29   :  { %515 = shalt.err (!%p512_p4)
}
  0x2a   :  { %s516_s24 = scalar_lea.vmem %s44_s15, 256  ;;  %p521_p6 = scmp.lt.s32.totalorder %s44_s15, %s44_s15 }
  0x2b   :  { %p517_p5 = scmp.ne.s32.totalorder %s44_s15, %s516_s24  ;;  %p522_p7 = scmp.lt.s32.totalorder %s516_s24, %s516_s24 }
  0x2d   :  { %p523_p8 = por %p522_p7, %p521_p6 }
  0x2f   :  { %p524_p9 = pnand %p523_p8, %p517_p5 }
  0x31   :  { %527 = shalt.err (!%p524_p9)
}
  0x32   :  { %49 = dma.hbm_to_vmem [thread:$0]  %s674_s3, 256, %s44_s15, [#allocation6], %s558_s27, %s558_s27, %s559_s28  }
  0x33   :  { %550 = dma.done.wait [#allocation3], 256  }
  0x34   :  { %551 = vsyncadd [#allocation3], 4294967040 }
  0x35   :  { %552 = dma.done.wait [#allocation6], 768  }
  0x36   :  { %553 = vsyncadd [#allocation6], 4294966528  ;;  %vm72_vm0 = vcmask 261120   ;;  %v61_v0 = vld [vmem:[#allocation5] sm:$0xff]  ;;  %v62_v1 = vld [vmem:[#allocation5 + $0x8] sm:$0xff]  ;;  %vm162_vm1 = vcmask 130048  }
  0x37   :  { %v63_v2 = vld [vmem:[#allocation5 + $0x10] sm:$0xff]  ;;  %v423_v3 = vpack.c.bf16 %v62_v1, %v61_v0  ;;  %v64_v4 = vld [vmem:[#allocation5 + $0x18] sm:$0xff]  ;;  %vm432_vm2 = vmpackc.low %vm162_vm1, %vm162_vm1  ;;  %s561_s26 = smov 112   ;;  %s563_s29 = smov [#allocation8]  }
  0x38   :  { %v59_v5 = vld [vmem:[#allocation2] sm:$0xff]  ;;  %v427_v6 = vpack.c.bf16 %v64_v4, %v63_v2  ;;  %v60_v7 = vld [vmem:[#allocation2 + $0x8] sm:$0xff]  ;;  %v154_v17 = vld [vmem:[#allocation7] sm:$0xff]  ;;  %s362_s30 = sshll.u32 %s563_s29, 4  ;;  %s363_s30 = int_to_ptr.vmem [resolvable:$true] %s362_s30 }
  0x39   :  { %406 = vmatprep.mubr.msk.f32.mxu0 %vm72_vm0, %v59_v5  ;;  %424 = vmatprep.subr.bf16.mxu0 %v423_v3  ;;  %v375_v8 = vld [vmem:[%s673_s2] ss:$0 sm:$0xff]  ;;  %v155_v19 = vld [vmem:[#allocation7 + $0x8] sm:$0xff]  ;;  %s562_s2 = smov 96   ;;  %s528_s5 = scalar_lea.vmem %s363_s30, 256 }
  0x3a   :  { %426 = vmatpush3.bf16.msra.mxu0 %v423_v3  ;;  %p529_p10 = scmp.ne.s32.totalorder %s363_s30, %s528_s5  ;;  %p533_p11 = scmp.lt.s32.totalorder %s363_s30, %s363_s30 }
  0x3b   :  { %428 = vmatprep.subr.bf16.mxu0 %v427_v6  ;;  %p534_p12 = scmp.lt.s32.totalorder %s528_s5, %s528_s5 }
  0x3d   :  { %p535_p13 = por %p534_p12, %p533_p11 }
  0x3e   :  { %430 = vmatpush3.bf16.msra.mxu0 %v427_v6 }
  0x3f   :  { %p536_p0 = pnand %p535_p13, %p529_p10 }
  0x41   :  { %407 = vmatmul.mubr.msk.f32.vlgmr.msra.gmra.mrb[0].mxu0 %vm72_vm0, %v60_v7 }
 0x114   :  { %v408_v9 = vpop.f32.mrb[0].mxu0 }
 0x115   :  { %v151_v10 = vadd.f32 %v408_v9, %v375_v8  ;;  %v145_v11 = vpop.f32.mrb[1].mxu0 }
 0x116   :  { %v146_v12 = vadd.f32 %v375_v8, %v145_v11 }
 0x118   :  { %158 = vrot.lane.b32.xlu0 %v146_v12, %s561_s26  ;;  %v431_v13 = vpack.c.bf16 %v151_v10, %v146_v12  ;;  %v449_v14 = vpack.i.bf16 %v151_v10, %v146_v12 }
 0x11a   :  { %433 = vmatprep.subr.msk.bf16.mxu1 %vm432_vm2, %v431_v13 }
 0x11b   :  { %436 = vmatpush3.bf16.xpose.msk.msra.mxu1 %vm432_vm2, %v431_v13 }
 0x11c   :  { %160 = vrot.lane.b32.xlu0 %v151_v10, %s561_s26 }
 0x18a   :  { %v159_v15 = vpop.permute.xlu0 %158 }
 0x18b   :  { %413 = vmatprep.mubr.msk.f32.mxu1 %vm162_vm1, %v159_v15 }
 0x18e   :  { %v161_v16 = vpop.permute.xlu0 %160 }
 0x18f   :  { %414 = vmatmul.mubr.msk.f32.vlgmr.msra.gmra.mrb[0].mxu1 %vm162_vm1, %v161_v16 }
 0x262   :  { %v415_v18 = vpop.f32.mrb[0].mxu1 }
 0x263   :  { %v237_v20 = vpop.f32.mrb[1].mxu1  ;;  %v243_v22 = vadd.f32 %v415_v18, %v155_v19 }
 0x264   :  { %v238_v21 = vadd.f32 %v237_v20, %v154_v17 }
 0x265   :  { %v249_v24 = vsel %vm162_vm1, %v243_v22, -inf }
 0x266   :  { %v246_v23 = vsel %vm162_vm1, %v238_v21, -inf }
 0x267   :  { %247 = vmax.xlane.f32.xlu1 %v246_v23 }
 0x26b   :  { %250 = vmax.xlane.f32.xlu1 %v249_v24 }
 0x2f4   :  { %v248_v25 = vpop.xlane.xlu1 %247 }
 0x2f5   :  { %v252_v26 = vsub.f32 %v238_v21, %v248_v25 }
 0x2f7   :  { %v254_v27 = vmul.f32 1.442695, %v252_v26 }
 0x2f8   :  { %v251_v28 = vpop.xlane.xlu1 %250 }
 0x2f9   :  { %454 = vpow2.f32 %v254_v27  ;;  %v253_v29 = vsub.f32 %v243_v22, %v251_v28 }
 0x2fb   :  { %v256_v30 = vmul.f32 1.442695, %v253_v29 }
 0x2fd   :  { %456 = vpow2.f32 %v256_v30 }
 0x303   :  { %v455_v31 = vpop.eup %454 }
 0x304   :  { %v258_v32 = vsel %vm162_vm1, %v455_v31, 0.0 }
 0x305   :  { %259 = vadd.xlane.f32.xlu0 %v258_v32 }
 0x307   :  { %v457_v33 = vpop.eup %456 }
 0x308   :  { %v261_v34 = vsel %vm162_vm1, %v457_v33, 0.0 }
 0x309   :  { %262 = vadd.xlane.f32.xlu1 %v261_v34 }
 0x31a   :  { %450 = vrot.lane.b32.xlu1 %v449_v14, %s562_s2 }
 0x392   :  { %v260_v35 = vpop.xlane.xlu0 %259 }
 0x393   :  { %458 = vrcp.f32 %v260_v35 }
 0x396   :  { %v263_v36 = vpop.xlane.xlu1 %262 }
 0x397   :  { %460 = vrcp.f32 %v263_v36 }
 0x39a   :  { %v451_v37 = vpop.permute.xlu1 %450 }
 0x39b   :  { %v453_v38 = vunpack.i.h.bf16 %v451_v37  ;;  %v452_v39 = vunpack.i.l.bf16 %v451_v37 }
 0x39d   :  { %v459_v40 = vpop.eup %458  ;;  %v437_v41 = vpack.c.bf16 %v453_v38, %v452_v39 }
 0x39e   :  { %v266_v42 = vmul.f32 %v459_v40, %v455_v31 }
 0x39f   :  { %438 = vmatprep.subr.bf16.mxu0 %v437_v41 }
 0x3a0   :  { %440 = vmatpush3.bf16.msra.mxu0 %v437_v41  ;;  %420 = vmatprep.mubr.msk.f32.mxu0 %vm162_vm1, %v266_v42 }
 0x3a1   :  { %v461_v43 = vpop.eup %460 }
 0x3a2   :  { %v267_v44 = vmul.f32 %v461_v43, %v457_v33 }
 0x3a4   :  { %421 = vmatmul.mubr.msk.f32.vlgmr.msra.gmra.mrb[2].mxu0 %vm162_vm1, %v267_v44 }
 0x477   :  { %v422_v45 = vpop.f32.mrb[2].mxu0 }
 0x478   :  { %356 = vst.msk [vmem:[#allocation8 + $0x8] sm:$0xff] %vm162_vm1, %v422_v45  ;;  %v346_v46 = vpop.f32.mrb[3].mxu0 }
 0x479   :  { %355 = vst.msk [vmem:[#allocation8] sm:$0xff] %vm162_vm1, %v346_v46 }
 0x47a   :  { %539 = shalt.err (!%p536_p0)
}
 0x47b   :  { %s540_s8 = scalar_lea.hbm %s675_s4, 256 }
 0x47c   :  { %p541_p1 = scmp.ne.s32.totalorder %s675_s4, %s540_s8  ;;  %p544_p2 = scmp.lt.u32.totalorder %s540_s8, %s675_s4 }
 0x47e   :  { %p546_p3 = pnand %p544_p2, %p541_p1 }
 0x480   :  { %549 = shalt.err (!%p546_p3)
}
 0x481   :  { %368 = dma.vmem_to_hbm [thread:$0]  %s363_s30, 256, %s675_s4, [#allocation4], %s558_s27, %s558_s27, %s559_s28  }
 0x482   :  { %554 = dma.done.wait [#allocation4], 256  }
 0x483   :  { %555 = vsyncadd [#allocation4], 4294967040 }
 0x484   :  { %372 = vsyncpa [#allocation3], 1 }
 0x485   :  { %373 = vsyncpa [#allocation6], 1 }
 0x486   :  { %374 = vsyncpa [#allocation4], 1 }

</bundles_post_ra>
